<compile_context>
chip_gen: v7x
topology: tpu7x:2x2x1
jax: 0.10.0
libtpu: 0.0.40
codegen_flags: <defaults>
</compile_context>

<pallas_src>
import functools

import jax
import jax.numpy as jnp
from jax.experimental import pallas as pl
from jax.experimental.pallas import tpu as pltpu

DEFAULT_M = 0.5
EPS = 1e-9          # used by the pure-JAX/PyTorch-parity reference (see kernel note)
_LANE = 128
_SUBLANE = 8


def _list_all_loss_kernel(pred_ref, label_ref, out_ref, *,
                          inv_m, batch, block_rows, mask_rows):
    # pred_ref / label_ref: (TB, C) tile, C = full (unpadded) class extent.
    x = pred_ref[...].astype(jnp.float32) * inv_m
    row_max = jnp.max(x, axis=1, keepdims=True)
    e = jnp.exp(x - row_max)
    denom = jnp.sum(e, axis=1, keepdims=True)
    # log-softmax rewrite: full-tile exp only; log is on the (TB,1) denom.
    # NOTE: the PyTorch module adds +1e-9 inside the log; that only changes
    # entries whose softmax probability is <~ 1e-6, so the exact/stable rewrite
    # is used instead (also removes the approx-reciprocal error).
    logp = (x - row_max) - jnp.log(denom)

    contrib = label_ref[...].astype(jnp.float32) * logp

    if mask_rows:
        # Ragged last tile: rows >= batch hold undefined (possibly NaN) data.
        i = pl.program_id(0)
        row_ids = i * block_rows + jax.lax.broadcasted_iota(
            jnp.int32, (block_rows, 1), 0)
        contrib = jnp.where(row_ids < batch, contrib, 0.0)

    # Per-block partial of the (negated) loss; cross-block sum is in the wrapper.
    out_ref[...] = (-jnp.sum(contrib)).reshape(1, 1, 1)


def _vmem_capacity_bytes():
    try:
        info = pltpu.get_tpu_info()
        cap = getattr(info, "vmem_capacity_bytes", None)
        if cap:
            return int(cap)
    except Exception:
        pass
    return 64 * 1024 * 1024   # conservative fallback (v7x per-TC VMEM)


def list_all_loss(y_pred, y_label, *, m=DEFAULT_M, block_rows=None):
    """loss = -sum(y_label * log(softmax(y_pred / m, axis=1) [+1e-9]))  (scalar f32)."""
    assert y_pred.shape == y_label.shape and y_pred.ndim == 2
    B, C = y_pred.shape
    inv_m = 1.0 / float(m)

    # Physical VMEM footprint of one row (lane axis padded to 128 internally).
    c_lanes = pl.cdiv(C, _LANE) * _LANE
    itemsize = max(jnp.dtype(y_pred.dtype).itemsize,
                   jnp.dtype(y_label.dtype).itemsize)
    # 2 inputs x 2 pipeline buffers of raw tiles + ~6 f32 full-tile temporaries.
    bytes_per_row = c_lanes * (2 * 2 * itemsize + 6 * 4)

    vmem_cap = _vmem_capacity_bytes()
    vmem_limit = vmem_cap * 3 // 4          # ~48 MiB on v7x, ~96 MiB on v5e/v6e

    if block_rows is None:
        budget = vmem_limit - (8 << 20)
        block_rows = max(budget // bytes_per_row, _SUBLANE)
    tb = int(min(block_rows, 8192, pl.cdiv(B, _SUBLANE) * _SUBLANE))
    tb = max(_SUBLANE, (tb // _SUBLANE) * _SUBLANE)

    # TODO(synk): for vocab-scale C (where even TB=8 overflows the budget) add a
    # class-axis grid dimension with an online softmax instead of huge tiles.
    vmem_limit = min(max(vmem_limit, tb * bytes_per_row + (8 << 20)),
                     vmem_cap - (4 << 20))

    grid = (pl.cdiv(B, tb),)
    kernel = functools.partial(
        _list_all_loss_kernel,
        inv_m=inv_m, batch=B, block_rows=tb, mask_rows=(B % tb != 0))

    partials = pl.pallas_call(
        kernel,
        out_shape=jax.ShapeDtypeStruct((grid[0], 1, 1), jnp.float32),
        grid_spec=pltpu.PrefetchScalarGridSpec(
            num_scalar_prefetch=0,
            grid=grid,
            in_specs=[
                pl.BlockSpec((tb, C), lambda i: (i, 0)),
                pl.BlockSpec((tb, C), lambda i: (i, 0)),
            ],
            out_specs=pl.BlockSpec((1, 1, 1), lambda i: (i, 0, 0)),
        ),
        compiler_params=pltpu.CompilerParams(
            dimension_semantics=(pltpu.PARALLEL,),
            vmem_limit_bytes=int(vmem_limit),
        ),
    )(y_pred, y_label)

    # Tiny final reduction (one f32 per grid block).
    # torch.mean of a 0-d tensor is the identity.
    return jnp.sum(partials)


def _reference(y_pred, y_label, m=DEFAULT_M):
    # Mirrors the PyTorch module exactly (softmax + 1e-9, then log).
    p = jax.nn.softmax(y_pred.astype(jnp.float32) / m, axis=1) + EPS
    return -jnp.sum(y_label.astype(jnp.float32) * jnp.log(p))


if __name__ == "__main__":
    key = jax.random.PRNGKey(0)
    k1, k2 = jax.random.split(key)
    # deliberately NOT multiples of 8 / 128 to exercise the in-kernel masking paths
    B, C = 21, 100
    y_pred = jax.random.normal(k1, (B, C), dtype=jnp.float32)
    # label distribution (rows sum to 1), as in a listwise ranking loss
    y_label = jax.nn.softmax(jax.random.normal(k2, (B, C), dtype=jnp.float32), axis=1)

    ref = _reference(y_pred, y_label)

    # default tiling (single partial block at this tiny size)
    loss = list_all_loss(y_pred, y_label)
    jax.block_until_ready(loss)
    assert jnp.allclose(loss, ref, rtol=1e-4, atol=1e-4), (loss, ref)

    # force a multi-block "parallel" grid + ragged last tile
    loss_tiled = list_all_loss(y_pred, y_label, block_rows=8)
    jax.block_until_ready(loss_tiled)
    assert jnp.allclose(loss_tiled, ref, rtol=1e-4, atol=1e-4), (loss_tiled, ref)

    # bf16 inputs stay narrow in HBM and are upcast in-kernel
    yp_bf16 = y_pred.astype(jnp.bfloat16)
    yl_bf16 = y_label.astype(jnp.bfloat16)
    loss_bf16 = list_all_loss(yp_bf16, yl_bf16)
    jax.block_until_ready(loss_bf16)
    ref_bf16 = _reference(yp_bf16, yl_bf16)
    assert jnp.allclose(loss_bf16, ref_bf16, rtol=2e-2, atol=2e-2), (loss_bf16, ref_bf16)

    print("KERNEL_OK")
</pallas_src>

<mosaic_0001>
module attributes {stable_mosaic.version = 11 : i64} {
  func.func @_list_all_loss_kernel(%arg0: i32, %arg1: memref<24x100xf32, #tpu.memory_space<vmem>>, %arg2: memref<24x100xf32, #tpu.memory_space<vmem>>, %arg3: memref<1x1x1xf32, #tpu.memory_space<vmem>>) attributes {dimension_semantics = [#tpu.dimension_semantics<parallel>], iteration_bounds = array<i64: 1>, scalar_prefetch = 0 : i64, scratch_operands = 0 : i64, tpu.core_type = #tpu.core_type<tc>, window_params = [{transform_indices = @transform_0, window_bounds = array<i64: 24, 100>}, {transform_indices = @transform_1, window_bounds = array<i64: 24, 100>}, {transform_indices = @transform_2, window_bounds = array<i64: 1, 1, 1>}]} {
    %c0 = arith.constant 0 : index
    %c0_0 = arith.constant 0 : index
    %0 = vector.load %arg1[%c0, %c0_0] : memref<24x100xf32, #tpu.memory_space<vmem>>, vector<24x100xf32>
    %cst = arith.constant 2.000000e+00 : f32
    %1 = vector.broadcast %cst : f32 to vector<24x100xf32>
    %2 = arith.mulf %0, %1 : vector<24x100xf32>
    %cst_1 = arith.constant dense<0xFF800000> : vector<24xf32>
    %3 = vector.multi_reduction <maximumf>, %2, %cst_1 [1] : vector<24x100xf32> to vector<24xf32>
    %4 = vector.shape_cast %3 : vector<24xf32> to vector<24x1xf32>
    %5 = vector.broadcast %4 : vector<24x1xf32> to vector<24x100xf32>
    %6 = arith.subf %2, %5 : vector<24x100xf32>
    %7 = math.exp %6 : vector<24x100xf32>
    %cst_2 = arith.constant dense<0.000000e+00> : vector<24xf32>
    %8 = vector.multi_reduction <add>, %7, %cst_2 [1] : vector<24x100xf32> to vector<24xf32>
    %9 = vector.shape_cast %8 : vector<24xf32> to vector<24x1xf32>
    %10 = vector.broadcast %4 : vector<24x1xf32> to vector<24x100xf32>
    %11 = arith.subf %2, %10 : vector<24x100xf32>
    %12 = math.log %9 : vector<24x1xf32>
    %13 = vector.broadcast %12 : vector<24x1xf32> to vector<24x100xf32>
    %14 = arith.subf %11, %13 : vector<24x100xf32>
    %c0_3 = arith.constant 0 : index
    %c0_4 = arith.constant 0 : index
    %15 = vector.load %arg2[%c0_3, %c0_4] : memref<24x100xf32, #tpu.memory_space<vmem>>, vector<24x100xf32>
    %16 = arith.mulf %15, %14 : vector<24x100xf32>
    %c24_i32 = arith.constant 24 : i32
    %17 = arith.muli %arg0, %c24_i32 : i32
    %18 = tpu.iota {dimensions = array<i32: 0>} : vector<24x1xi32>
    %19 = vector.broadcast %17 : i32 to vector<24x1xi32>
    %20 = arith.addi %19, %18 : vector<24x1xi32>
    %c21_i32 = arith.constant 21 : i32
    %21 = vector.broadcast %c21_i32 : i32 to vector<24x1xi32>
    %22 = arith.cmpi slt, %20, %21 : vector<24x1xi32>
    %cst_5 = arith.constant 0.000000e+00 : f32
    %23 = vector.shape_cast %22 : vector<24x1xi1> to vector<24x1xi1>
    %24 = vector.broadcast %23 : vector<24x1xi1> to vector<24x100xi1>
    %25 = vector.broadcast %cst_5 : f32 to vector<24x100xf32>
    %26 = arith.select %24, %16, %25 : vector<24x100xi1>, vector<24x100xf32>
    %27 = vector.shape_cast %26 : vector<24x100xf32> to vector<1x24x100xf32>
    %cst_6 = arith.constant dense<0.000000e+00> : vector<1xf32>
    %28 = vector.multi_reduction <add>, %27, %cst_6 [1, 2] : vector<1x24x100xf32> to vector<1xf32>
    %29 = vector.shape_cast %28 : vector<1xf32> to vector<1x1x1xf32>
    %30 = vector.extract %29[0, 0, 0] : f32 from vector<1x1x1xf32>
    %cst_7 = arith.constant 0.000000e+00 : f32
    %31 = arith.subf %cst_7, %30 : f32
    %32 = vector.broadcast %31 : f32 to vector<1x1x1xf32>
    %c0_8 = arith.constant 0 : index
    %c0_9 = arith.constant 0 : index
    %c0_10 = arith.constant 0 : index
    %33 = vector.load %arg3[%c0_8, %c0_9, %c0_10] : memref<1x1x1xf32, #tpu.memory_space<vmem>>, vector<1x1x1xf32>
    tpu.vector_store %arg3[%c0_8, %c0_9, %c0_10], %32 {strides = array<i32>} : memref<1x1x1xf32, #tpu.memory_space<vmem>>, vector<1x1x1xf32>,
    return
  }
  func.func @transform_0(%arg0: i32) -> (i32, i32) {
    %c0_i32 = arith.constant 0 : i32
    %c0_i32_0 = arith.constant 0 : i32
    return %arg0, %c0_i32 : i32, i32
  }
  func.func @transform_1(%arg0: i32) -> (i32, i32) {
    %c0_i32 = arith.constant 0 : i32
    %c0_i32_0 = arith.constant 0 : i32
    return %arg0, %c0_i32 : i32, i32
  }
  func.func @transform_2(%arg0: i32) -> (i32, i32, i32) {
    %c0_i32 = arith.constant 0 : i32
    %c0_i32_0 = arith.constant 0 : i32
    %c0_i32_1 = arith.constant 0 : i32
    return %arg0, %c0_i32, %c0_i32_0 : i32, i32, i32
  }
}

</mosaic_0001>

<bundles_post_ra>
// kernel: tpu_custom_call.1
= control target key start
LH: loop header
LB: loop body
LE: loop exit
PB: predicated region body
PF: predicated region fallthrough
CT: control target
= control target key end

     0   :  { %7 = vsyncpa [#allocation3], 0  ;;  %s300_s0 = inlined_call_operand.hbm [shape: f32[21,100], index: 0, kind: input, shape index: {}]   ;;  %s301_s1 = inlined_call_operand.hbm [shape: f32[21,100], index: 1, kind: input, shape index: {}]   ;;  %s302_s2 = inlined_call_operand.hbm [shape: f32[1,1,1], index: 2, kind: output, shape index: {}]  }
   0x1   :  { %8 = vsyncpa [#allocation6], 0 }
   0x2   :  { %9 = vsyncpa [#allocation4], 0  ;;  %s235_s9 = smov [#allocation2]   ;;  %s163_s13 = scalar_lea.hbm %s300_s0, 384 }
   0x3   :  { %s15_s10 = sshll.u32 %s235_s9, 4  ;;  %p164_p0 = scmp.ne.s32.totalorder %s300_s0, %s163_s13  ;;  %s16_s10 = int_to_ptr.vmem [resolvable:$true] %s15_s10 }
   0x4   :  { %p167_p1 = scmp.lt.u32.totalorder %s163_s13, %s300_s0 }
   0x6   :  { %p169_p2 = pnand %p167_p1, %p164_p0 }
   0x8   :  { %172 = shalt.err (!%p169_p2)
}
   0x9   :  { %s173_s18 = scalar_lea.vmem %s16_s10, 384  ;;  %p178_p4 = scmp.lt.s32.totalorder %s16_s10, %s16_s10 }
   0xa   :  { %p174_p3 = scmp.ne.s32.totalorder %s16_s10, %s173_s18  ;;  %p179_p5 = scmp.lt.s32.totalorder %s173_s18, %s173_s18 }
   0xc   :  { %p180_p6 = por %p179_p5, %p178_p4 }
   0xe   :  { %p181_p7 = pnand %p180_p6, %p174_p3 }
  0x10   :  { %184 = shalt.err (!%p181_p7)
}
  0x11   :  { %s236_s19 = smov 128   ;;  %s237_s20 = smov 8  }
  0x12   :  { %21 = dma.hbm_to_vmem [thread:$0]  %s300_s0, 384, %s16_s10, [#allocation3], %s236_s19, %s236_s19, %s237_s20  }
  0x13   :  { %s238_s23 = smov [#allocation5]   ;;  %s185_s27 = scalar_lea.hbm %s301_s1, 384 }
  0x14   :  { %s27_s24 = sshll.u32 %s238_s23, 4  ;;  %p186_p8 = scmp.ne.s32.totalorder %s301_s1, %s185_s27  ;;  %s28_s24 = int_to_ptr.vmem [resolvable:$true] %s27_s24 }
  0x15   :  { %p189_p9 = scmp.lt.u32.totalorder %s185_s27, %s301_s1 }
  0x17   :  { %p191_p10 = pnand %p189_p9, %p186_p8 }
  0x19   :  { %194 = shalt.err (!%p191_p10)
}
  0x1a   :  { %s195_s4 = scalar_lea.vmem %s28_s24, 384  ;;  %p200_p12 = scmp.lt.s32.totalorder %s28_s24, %s28_s24 }
  0x1b   :  { %p196_p11 = scmp.ne.s32.totalorder %s28_s24, %s195_s4  ;;  %p201_p13 = scmp.lt.s32.totalorder %s195_s4, %s195_s4 }
  0x1d   :  { %p202_p0 = por %p201_p13, %p200_p12 }
  0x1f   :  { %p203_p1 = pnand %p202_p0, %p196_p11 }
  0x21   :  { %206 = shalt.err (!%p203_p1)
}
  0x22   :  { %33 = dma.hbm_to_vmem [thread:$0]  %s301_s1, 384, %s28_s24, [#allocation6], %s236_s19, %s236_s19, %s237_s20  }
  0x23   :  { %229 = dma.done.wait [#allocation3], 384  }
  0x24   :  { %230 = vsyncadd [#allocation3], 4294966912 }
  0x25   :  { %231 = dma.done.wait [#allocation6], 384  }
  0x26   :  { %232 = vsyncadd [#allocation6], 4294966912  ;;  %v40_v0 = vld [vmem:[#allocation2] sm:$0xff]  ;;  %vm46_vm0 = vcmask 818176   ;;  %v42_v1 = vld [vmem:[#allocation2 + $0x10] sm:$0xff]  ;;  %v90_v27 = vlaneseq  ;;  %s239_s1 = smov [#allocation7]  }
  0x27   :  { %v41_v2 = vld [vmem:[#allocation2 + $0x8] sm:$0xff]  ;;  %v43_v3 = vmul.f32 2.0, %v40_v0  ;;  %v45_v4 = vmul.f32 2.0, %v42_v1  ;;  %v83_v36 = vld [vmem:[#allocation5] sm:$0xff]  ;;  %v84_v40 = vld [vmem:[#allocation5 + $0x8] sm:$0xff]  ;;  %s134_s6 = sshll.u32 %s239_s1, 4  ;;  %s135_s6 = int_to_ptr.vmem [resolvable:$true] %s134_s6 }
  0x28   :  { %v44_v5 = vmul.f32 2.0, %v41_v2  ;;  %v91_v29 = vshrl.u32 %v90_v27, 7  ;;  %v85_v38 = vld [vmem:[#allocation5 + $0x10] sm:$0xff]  ;;  %vm126_vm2 = vcmask 0   ;;  %s207_s9 = scalar_lea.vmem %s135_s6, 16  ;;  %s211_s10 = scalar_lea.vmem %s135_s6, 32 }
  0x29   :  { %v47_v6 = vsel %vm46_vm0, %v43_v3, -inf  ;;  %v53_v7 = vsel %vm46_vm0, %v45_v4, -inf  ;;  %p208_p2 = scmp.ne.s32.totalorder %s135_s6, %s207_s9  ;;  %p212_p3 = scmp.lt.s32.totalorder %s135_s6, %s135_s6 }
  0x2a   :  { %48 = vmax.xlane.f32.xlu0 %v47_v6  ;;  %54 = vmax.xlane.f32.xlu1 %v53_v7  ;;  %v50_v8 = vsel %vm46_vm0, %v44_v5, -inf  ;;  %v93_v33 = vadd.s32 16, %v91_v29  ;;  %p213_p4 = scmp.lt.s32.totalorder %s211_s10, %s207_s9 }
  0x2c   :  { %vm100_vm1 = vcmp.lt.s32.totalorder %v93_v33, 21  ;;  %p214_p5 = por %p213_p4, %p212_p3 }
  0x2e   :  { %51 = vmax.xlane.f32.xlu0 %v50_v8  ;;  %p215_p6 = pnand %p214_p5, %p208_p2 }
  0xb7   :  { %v49_v9 = vpop.xlane.xlu0 %48  ;;  %v55_v10 = vpop.xlane.xlu1 %54 }
  0xb8   :  { %v56_v11 = vsub.f32 %v43_v3, %v49_v9  ;;  %v58_v12 = vsub.f32 %v45_v4, %v55_v10 }
  0xba   :  { %v59_v13 = vmul.f32 1.442695, %v56_v11  ;;  %v63_v14 = vmul.f32 1.442695, %v58_v12 }
  0xbb   :  { %v52_v15 = vpop.xlane.xlu0 %51 }
  0xbc   :  { %151 = vpow2.f32 %v59_v13  ;;  %v57_v16 = vsub.f32 %v44_v5, %v52_v15 }
  0xbd   :  { %153 = vpow2.f32 %v63_v14 }
  0xbe   :  { %v61_v17 = vmul.f32 1.442695, %v57_v16 }
  0xc0   :  { %155 = vpow2.f32 %v61_v17 }
  0xc6   :  { %v152_v18 = vpop.eup %151 }
  0xc7   :  { %v154_v19 = vpop.eup %153  ;;  %v65_v20 = vsel %vm46_vm0, %v152_v18, 0.0 }
  0xc8   :  { %66 = vadd.xlane.f32.xlu1 %v65_v20  ;;  %v71_v21 = vsel %vm46_vm0, %v154_v19, 0.0 }
  0xca   :  { %v156_v22 = vpop.eup %155 }
  0xcb   :  { %v68_v23 = vsel %vm46_vm0, %v156_v22, 0.0 }
  0xcc   :  { %72 = vadd.xlane.f32.xlu1 %v71_v21  ;;  %69 = vadd.xlane.f32.xlu0 %v68_v23 }
 0x155   :  { %v67_v24 = vpop.xlane.xlu1 %66 }
 0x156   :  { %157 = vlog2.f32 %v67_v24 }
 0x159   :  { %v73_v25 = vpop.xlane.xlu1 %72  ;;  %v70_v26 = vpop.xlane.xlu0 %69 }
 0x15a   :  { %159 = vlog2.f32 %v73_v25 }
 0x15b   :  { %161 = vlog2.f32 %v70_v26 }
 0x160   :  { %v158_v28 = vpop.eup %157 }
 0x161   :  { %v75_v30 = vmul.f32 0.6931472, %v158_v28 }
 0x163   :  { %v80_v32 = vsub.f32 %v56_v11, %v75_v30 }
 0x164   :  { %v160_v31 = vpop.eup %159 }
 0x165   :  { %v162_v34 = vpop.eup %161  ;;  %v79_v35 = vmul.f32 0.6931472, %v160_v31  ;;  %v86_v42 = vmul.f32 %v83_v36, %v80_v32 }
 0x166   :  { %v77_v37 = vmul.f32 0.6931472, %v162_v34 }
 0x167   :  { %v82_v39 = vsub.f32 %v58_v12, %v79_v35  ;;  %v110_v46 = vsel %vm46_vm0, %v86_v42, 0.0 }
 0x168   :  { %v81_v41 = vsub.f32 %v57_v16, %v77_v37 }
 0x169   :  { %v88_v43 = vmul.f32 %v85_v38, %v82_v39 }
 0x16a   :  { %v87_v44 = vmul.f32 %v84_v40, %v81_v41 }
 0x16b   :  { %v109_v45 = vsel %vm100_vm1, %v88_v43, 0.0 }
 0x16c   :  { %v111_v47 = vsel %vm46_vm0, %v87_v44, 0.0  ;;  %v113_v48 = vsel %vm46_vm0, %v109_v45, 0.0 }
 0x16d   :  { %v112_v49 = vadd.f32 %v111_v47, %v110_v46 }
 0x16f   :  { %v114_v50 = vadd.f32 %v113_v48, %v112_v49 }
 0x171   :  { %115 = vadd.xlane.f32.xlu0 %v114_v50 }
 0x1fe   :  { %v116_v51 = vpop.xlane.xlu0 %115 }
 0x1ff   :  { %v117_v52 = vrot.slane %v116_v51, 4 }
 0x201   :  { %v118_v53 = vadd.f32 %v117_v52, %v116_v51 }
 0x203   :  { %v119_v54 = vrot.slane %v118_v53, 2 }
 0x205   :  { %v120_v55 = vadd.f32 %v119_v54, %v118_v53 }
 0x207   :  { %v121_v56 = vrot.slane %v120_v55, 1 }
 0x209   :  { %v122_v57 = vadd.f32 %v121_v56, %v120_v55 }
 0x20b   :  { %144 = vpush %v122_v57 }
 0x23c   :  { %s145_s7 = spop %144 }
 0x23d   :  { %s124_s8 = ssub.f32 0.0, %s145_s7 }
 0x23f   :  { %v125_v58 = vstv %s124_s8 }
 0x240   :  { %127 = vst.msk [vmem:[#allocation7] sm:$0x1] %vm126_vm2, %v125_v58 }
 0x241   :  { %218 = shalt.err (!%p215_p6)
}
 0x242   :  { %s219_s13 = scalar_lea.hbm %s302_s2, 16 }
 0x243   :  { %p220_p7 = scmp.ne.s32.totalorder %s302_s2, %s219_s13  ;;  %p223_p8 = scmp.lt.u32.totalorder %s219_s13, %s302_s2 }
 0x245   :  { %p225_p9 = pnand %p223_p8, %p220_p7 }
 0x247   :  { %228 = shalt.err (!%p225_p9)
}
 0x248   :  { %137 = dma.vmem_to_hbm [thread:$0]  %s135_s6, 16, %s302_s2, [#allocation4]  }
 0x249   :  { %233 = dma.done.wait [#allocation4], 16  }
 0x24a   :  { %234 = vsyncadd [#allocation4], 4294967280 }
 0x24b   :  { %141 = vsyncpa [#allocation3], 1 }
 0x24c   :  { %142 = vsyncpa [#allocation6], 1 }
 0x24d   :  { %143 = vsyncpa [#allocation4], 1 }

</bundles_post_ra>
